<compile_context>
chip_gen: v6e
topology: v6e:2x2x1
jax: 0.10.0
libtpu: 0.0.40
codegen_flags: <defaults>
</compile_context>

<pallas_src>
import jax
import jax.numpy as jnp
from jax.experimental import pallas as pl
from jax.experimental.pallas import tpu as pltpu


def _round_up(n, m):
    return ((n + m - 1) // m) * m


def _cdiv(a, b):
    return (a + b - 1) // b


# ----------------------------------------------------------------------------
# Kernel: one batch tile through ALL K ensemble members in a single grid step.
# ----------------------------------------------------------------------------
def _ensemble_mlp_kernel(x_ref, w1_ref, b1_ref, w2_ref, b2_ref, o_ref):
    # x_ref : (Bt, Din)        — one batch tile (shared by all members)
    # w1_ref: (Din, K*H)       — all members' layer-1 weights, side by side
    # b1_ref: (1,  K*H)  f32
    # w2_ref: (K*H, N2p)       — block-diagonal layer-2 weights (lane-padded)
    # b2_ref: (1,  N2p)  f32
    # o_ref : (Bt, N2p)        — lane-dense output slab
    h = jnp.dot(x_ref[...], w1_ref[...], preferred_element_type=jnp.float32)
    h = jnp.maximum(h + b1_ref[...], 0.0)                       # bias + ReLU (f32)
    o = jnp.dot(h.astype(w2_ref.dtype), w2_ref[...],
                preferred_element_type=jnp.float32)
    o_ref[...] = (o + b2_ref[...]).astype(o_ref.dtype)


# ----------------------------------------------------------------------------
# One-time layout plumbing (hoisted out of the per-call forward path).
# ----------------------------------------------------------------------------
def prepare_multi_module_params(w1, b1, w2, b2, *, compute_dtype=jnp.float32):
    """Precompute kernel-friendly weight layout ONCE (at param-update time).

    w1: (K, Din, H)   b1: (K, 1, H)   w2: (K, H, Dout)   b2: (K, 1, Dout)
    """
    K, Din, H = w1.shape
    Dout = w2.shape[-1]
    N1 = K * H
    N2 = K * Dout
    if N2 > 128:
        # TODO(synk): for wide ensembles (K*Dout > 128) the block-diagonal
        # layer-2 matmul does ~K x redundant zero-block MXU work; switch layer 2
        # to K unrolled per-member dots or add a member grid axis in that regime.
        raise NotImplementedError("block-diagonal layer-2 path requires K*Dout <= 128")
    N2p = _round_up(N2, 128)            # lane-dense output width (unmasked stores)

    # Layer 1 as one wide matrix: column k*H + h  <-  w1[k, :, h].
    w1_wide = jnp.transpose(w1, (1, 0, 2)).reshape(Din, N1).astype(compute_dtype)
    b1_wide = b1.reshape(1, N1).astype(jnp.float32)

    # Layer 2 as a block-diagonal matrix (keeps members independent, exact math),
    # zero-padded on the lane axis up to N2p.
    eye = jnp.eye(K, dtype=w2.dtype)
    w2_bd = jnp.einsum("khd,kj->khjd", w2, eye).reshape(N1, N2)
    w2_bd = jnp.pad(w2_bd, ((0, 0), (0, N2p - N2))).astype(compute_dtype)
    b2_wide = jnp.pad(b2.reshape(1, N2), ((0, 0), (0, N2p - N2))).astype(jnp.float32)

    return dict(
        w1_wide=w1_wide, b1_wide=b1_wide, w2_bd=w2_bd, b2_wide=b2_wide,
        K=K, Din=Din, H=H, Dout=Dout, N1=N1, N2=N2, N2p=N2p,
        compute_dtype=jnp.dtype(compute_dtype),
    )


def _choose_batch_tile(B, batch_block, n1, hidden_budget_bytes):
    # Cap the tile against the (bt, N1) float32 hidden intermediate that lives
    # between the two dots (avoids vreg spill / VMEM blowup for large K*H).
    cap = max(16, ((hidden_budget_bytes // (4 * n1)) // 16) * 16)
    target = max(16, min(_round_up(batch_block, 16), cap))
    # Balance the tiles (small last-tile waste) and give the "parallel" grid
    # axis at least 2 steps when the batch allows (v7x has 2 TensorCores).
    nt = _cdiv(B, target)
    if B > 16:
        nt = max(nt, 2)
    bt = min(_round_up(_cdiv(B, nt), 16), target)
    return bt


# ----------------------------------------------------------------------------
# Forward: out[k] = relu(x @ w1[k] + b1[k]) @ w2[k] + b2[k]   -> (K, B, Dout)
# ----------------------------------------------------------------------------
def multi_module_forward(x, params, *, batch_block=256, hidden_budget_bytes=8 << 20):
    B, Din = x.shape
    assert Din == params["Din"], (Din, params["Din"])
    K, Dout = params["K"], params["Dout"]
    N1, N2, N2p = params["N1"], params["N2"], params["N2p"]
    compute_dtype = params["compute_dtype"]

    bt = _choose_batch_tile(B, batch_block, N1, hidden_budget_bytes)
    b_pad = _round_up(B, bt)
    grid = (b_pad // bt,)

    x_c = x.astype(compute_dtype)
    if b_pad != B:
        x_c = jnp.pad(x_c, ((0, b_pad - B), (0, 0)))

    # Output slab dtype: compute dtype (bf16 slab halves store traffic in the
    # bf16 mode); cast back to x.dtype in the wrapper.
    slab_dtype = compute_dtype
    itemsize = jnp.dtype(compute_dtype).itemsize
    cost = pl.CostEstimate(
        flops=2 * b_pad * (Din * N1 + N1 * N2p),
        transcendentals=0,
        bytes_accessed=(b_pad * Din * itemsize          # x tiles
                        + Din * N1 * itemsize           # W1 wide (resident)
                        + N1 * N2p * itemsize           # W2 block-diag (resident)
                        + 4 * (N1 + N2p)                # biases (f32)
                        + b_pad * N2p * jnp.dtype(slab_dtype).itemsize),
    )

    def build_in_specs(single_buffer_weights):
        if single_buffer_weights:
            # Constant index_maps => DMA'd once & resident; Buffered(1) stops
            # Pallas from uselessly double-buffering them (halves resident VMEM).
            def resident(shape):
                return pl.BlockSpec(shape, lambda i: (0, 0),
                                    pipeline_mode=pl.Buffered(1))
        else:
            def resident(shape):
                return pl.BlockSpec(shape, lambda i: (0, 0))
        return [
            pl.BlockSpec((bt, Din), lambda i: (i, 0)),   # x tile (streams)
            resident((Din, N1)),                         # W1 wide      (resident)
            resident((1, N1)),                           # b1 wide      (resident)
            resident((N1, N2p)),                         # W2 block-diag(resident)
            resident((1, N2p)),                          # b2 wide      (resident)
        ]

    def run(single_buffer_weights):
        return pl.pallas_call(
            _ensemble_mlp_kernel,
            out_shape=jax.ShapeDtypeStruct((b_pad, N2p), slab_dtype),
            grid_spec=pltpu.PrefetchScalarGridSpec(
                num_scalar_prefetch=0,
                grid=grid,
                in_specs=build_in_specs(single_buffer_weights),
                out_specs=pl.BlockSpec((bt, N2p), lambda i: (i, 0)),
            ),
            compiler_params=pltpu.CompilerParams(
                dimension_semantics=("parallel",),
            ),
            cost_estimate=cost,
        )(x_c, params["w1_wide"], params["b1_wide"],
          params["w2_bd"], params["b2_wide"])

    try:
        out_wide = run(True)
    except Exception:
        # pl.Buffered(1) not supported on this jax build/backend: fall back to
        # default (double-buffered) specs so the kernel still runs.
        out_wide = run(False)

    # Un-pad and restore torch.stack layout: (B, K*Dout) -> (K, B, Dout).
    out = out_wide[:B, :N2].astype(x.dtype)
    return jnp.transpose(out.reshape(B, K, Dout), (1, 0, 2))


def _reference_forward(x, w1, b1, w2, b2):
    # Plain-JAX reference: stack of per-member MLPs (== torch.stack semantics).
    h = jnp.maximum(jnp.einsum("bd,kdh->kbh", x, w1) + b1, 0.0)
    return jnp.einsum("kbh,kho->kbo", h, w2) + b2


if __name__ == "__main__":
    # Small deterministic shapes consistent with a multi-Q-network ensemble.
    K, B, Din, H, Dout = 4, 8, 32, 32, 8

    key = jax.random.PRNGKey(0)
    kx, kw1, kb1, kw2, kb2 = jax.random.split(key, 5)

    x = jax.random.normal(kx, (B, Din), dtype=jnp.float32)
    w1 = jax.random.normal(kw1, (K, Din, H), dtype=jnp.float32) / jnp.sqrt(Din)
    b1 = 0.01 * jax.random.normal(kb1, (K, 1, H), dtype=jnp.float32)
    w2 = jax.random.normal(kw2, (K, H, Dout), dtype=jnp.float32) / jnp.sqrt(H)
    b2 = 0.01 * jax.random.normal(kb2, (K, 1, Dout), dtype=jnp.float32)

    # Layout plumbing hoisted out of the forward path (done once per parameter
    # update).  float32 compute => parity with the PyTorch/float32 reference;
    # pass compute_dtype=jnp.bfloat16 for the fast MXU path (intentional
    # precision change, accumulation stays f32).
    params = prepare_multi_module_params(w1, b1, w2, b2, compute_dtype=jnp.float32)

    out = multi_module_forward(x, params)
    out = jax.block_until_ready(out)

    ref = _reference_forward(x, w1, b1, w2, b2)
    assert out.shape == (K, B, Dout), out.shape
    assert jnp.allclose(out, ref, atol=2e-2, rtol=2e-2), "mismatch vs reference"

    print("KERNEL_OK")
</pallas_src>

<mosaic_0001>
module attributes {stable_mosaic.version = 11 : i64} {
  func.func @_ensemble_mlp_kernel(%arg0: i32, %arg1: memref<16x32xf32, #tpu.memory_space<vmem>>, %arg2: memref<32x128xf32, #tpu.memory_space<vmem>>, %arg3: memref<1x128xf32, #tpu.memory_space<vmem>>, %arg4: memref<128x128xf32, #tpu.memory_space<vmem>>, %arg5: memref<1x128xf32, #tpu.memory_space<vmem>>, %arg6: memref<16x128xf32, #tpu.memory_space<vmem>>) attributes {dimension_semantics = [#tpu.dimension_semantics<parallel>], iteration_bounds = array<i64: 1>, scalar_prefetch = 0 : i64, scratch_operands = 0 : i64, tpu.core_type = #tpu.core_type<tc>, window_params = [{transform_indices = @transform_0, window_bounds = array<i64: 16, 32>}, {pipeline_mode = #tpu.pipeline_mode<synchronous>, transform_indices = @transform_1, window_bounds = array<i64: 32, 128>}, {pipeline_mode = #tpu.pipeline_mode<synchronous>, transform_indices = @transform_2, window_bounds = array<i64: 1, 128>}, {pipeline_mode = #tpu.pipeline_mode<synchronous>, transform_indices = @transform_3, window_bounds = array<i64: 128, 128>}, {pipeline_mode = #tpu.pipeline_mode<synchronous>, transform_indices = @transform_4, window_bounds = array<i64: 1, 128>}, {transform_indices = @transform_5, window_bounds = array<i64: 16, 128>}]} {
    %c0 = arith.constant 0 : index
    %c0_0 = arith.constant 0 : index
    %0 = vector.load %arg1[%c0, %c0_0] : memref<16x32xf32, #tpu.memory_space<vmem>>, vector<16x32xf32>
    %c0_1 = arith.constant 0 : index
    %c0_2 = arith.constant 0 : index
    %1 = vector.load %arg2[%c0_1, %c0_2] : memref<32x128xf32, #tpu.memory_space<vmem>>, vector<32x128xf32>
    %cst = arith.constant dense<0.000000e+00> : vector<16x128xf32>
    %2 = tpu.matmul %0, %1, %cst {dimension_numbers = #tpu.dot_dimension_numbers<[1], [0], [0], [1], [0, 0, 1, 1], [], []>} : vector<16x32xf32>, vector<32x128xf32>, vector<16x128xf32> -> vector<16x128xf32>
    %c0_3 = arith.constant 0 : index
    %c0_4 = arith.constant 0 : index
    %3 = vector.load %arg3[%c0_3, %c0_4] : memref<1x128xf32, #tpu.memory_space<vmem>>, vector<1x128xf32>
    %4 = vector.broadcast %3 : vector<1x128xf32> to vector<16x128xf32>
    %5 = arith.addf %2, %4 : vector<16x128xf32>
    %cst_5 = arith.constant 0.000000e+00 : f32
    %6 = vector.broadcast %cst_5 : f32 to vector<16x128xf32>
    %7 = arith.maximumf %5, %6 : vector<16x128xf32>
    %c0_6 = arith.constant 0 : index
    %c0_7 = arith.constant 0 : index
    %8 = vector.load %arg4[%c0_6, %c0_7] : memref<128x128xf32, #tpu.memory_space<vmem>>, vector<128x128xf32>
    %cst_8 = arith.constant dense<0.000000e+00> : vector<16x128xf32>
    %9 = tpu.matmul %7, %8, %cst_8 {dimension_numbers = #tpu.dot_dimension_numbers<[1], [0], [0], [1], [0, 0, 1, 1], [], []>} : vector<16x128xf32>, vector<128x128xf32>, vector<16x128xf32> -> vector<16x128xf32>
    %c0_9 = arith.constant 0 : index
    %c0_10 = arith.constant 0 : index
    %10 = vector.load %arg5[%c0_9, %c0_10] : memref<1x128xf32, #tpu.memory_space<vmem>>, vector<1x128xf32>
    %11 = vector.broadcast %10 : vector<1x128xf32> to vector<16x128xf32>
    %12 = arith.addf %9, %11 : vector<16x128xf32>
    %c0_11 = arith.constant 0 : index
    %c0_12 = arith.constant 0 : index
    %13 = vector.load %arg6[%c0_11, %c0_12] : memref<16x128xf32, #tpu.memory_space<vmem>>, vector<16x128xf32>
    tpu.vector_store %arg6[%c0_11, %c0_12], %12 {strides = array<i32>} : memref<16x128xf32, #tpu.memory_space<vmem>>, vector<16x128xf32>,
    return
  }
  func.func @transform_0(%arg0: i32) -> (i32, i32) {
    %c0_i32 = arith.constant 0 : i32
    %c0_i32_0 = arith.constant 0 : i32
    return %arg0, %c0_i32 : i32, i32
  }
  func.func @transform_1(%arg0: i32) -> (i32, i32) {
    %c0_i32 = arith.constant 0 : i32
    %c0_i32_0 = arith.constant 0 : i32
    %c0_i32_1 = arith.constant 0 : i32
    return %c0_i32, %c0_i32_0 : i32, i32
  }
  func.func @transform_2(%arg0: i32) -> (i32, i32) {
    %c0_i32 = arith.constant 0 : i32
    %c0_i32_0 = arith.constant 0 : i32
    %c0_i32_1 = arith.constant 0 : i32
    return %c0_i32, %c0_i32_0 : i32, i32
  }
  func.func @transform_3(%arg0: i32) -> (i32, i32) {
    %c0_i32 = arith.constant 0 : i32
    %c0_i32_0 = arith.constant 0 : i32
    %c0_i32_1 = arith.constant 0 : i32
    return %c0_i32, %c0_i32_0 : i32, i32
  }
  func.func @transform_4(%arg0: i32) -> (i32, i32) {
    %c0_i32 = arith.constant 0 : i32
    %c0_i32_0 = arith.constant 0 : i32
    %c0_i32_1 = arith.constant 0 : i32
    return %c0_i32, %c0_i32_0 : i32, i32
  }
  func.func @transform_5(%arg0: i32) -> (i32, i32) {
    %c0_i32 = arith.constant 0 : i32
    %c0_i32_0 = arith.constant 0 : i32
    return %arg0, %c0_i32 : i32, i32
  }
}

module attributes {stable_mosaic.version = 11 : i64} {
  func.func @_ensemble_mlp_kernel(%arg0: i32, %arg1: memref<16x32xf32, #tpu.memory_space<vmem>>, %arg2: memref<32x128xf32, #tpu.memory_space<vmem>>, %arg3: memref<1x128xf32, #tpu.memory_space<vmem>>, %arg4: memref<128x128xf32, #tpu.memory_space<vmem>>, %arg5: memref<1x128xf32, #tpu.memory_space<vmem>>, %arg6: memref<16x128xf32, #tpu.memory_space<vmem>>) attributes {dimension_semantics = [#tpu.dimension_semantics<parallel>], iteration_bounds = array<i64: 1>, scalar_prefetch = 0 : i64, scratch_operands = 0 : i64, tpu.core_type = #tpu.core_type<tc>, window_params = [{transform_indices = @transform_0, window_bounds = array<i64: 16, 32>}, {pipeline_mode = #tpu.pipeline_mode<synchronous>, transform_indices = @transform_1, window_bounds = array<i64: 32, 128>}, {pipeline_mode = #tpu.pipeline_mode<synchronous>, transform_indices = @transform_2, window_bounds = array<i64: 1, 128>}, {pipeline_mode = #tpu.pipeline_mode<synchronous>, transform_indices = @transform_3, window_bounds = array<i64: 128, 128>}, {pipeline_mode = #tpu.pipeline_mode<synchronous>, transform_indices = @transform_4, window_bounds = array<i64: 1, 128>}, {transform_indices = @transform_5, window_bounds = array<i64: 16, 128>}]} {
    %c0 = arith.constant 0 : index
    %c0_0 = arith.constant 0 : index
    %0 = vector.load %arg1[%c0, %c0_0] : memref<16x32xf32, #tpu.memory_space<vmem>>, vector<16x32xf32>
    %c0_1 = arith.constant 0 : index
    %c0_2 = arith.constant 0 : index
    %1 = vector.load %arg2[%c0_1, %c0_2] : memref<32x128xf32, #tpu.memory_space<vmem>>, vector<32x128xf32>
    %cst = arith.constant dense<0.000000e+00> : vector<16x128xf32>
    %2 = tpu.matmul %0, %1, %cst {dimension_numbers = #tpu.dot_dimension_numbers<[1], [0], [0], [1], [0, 0, 1, 1], [], []>} : vector<16x32xf32>, vector<32x128xf32>, vector<16x128xf32> -> vector<16x128xf32>
    %c0_3 = arith.constant 0 : index
    %c0_4 = arith.constant 0 : index
    %3 = vector.load %arg3[%c0_3, %c0_4] : memref<1x128xf32, #tpu.memory_space<vmem>>, vector<1x128xf32>
    %4 = vector.broadcast %3 : vector<1x128xf32> to vector<16x128xf32>
    %5 = arith.addf %2, %4 : vector<16x128xf32>
    %cst_5 = arith.constant 0.000000e+00 : f32
    %6 = vector.broadcast %cst_5 : f32 to vector<16x128xf32>
    %7 = arith.maximumf %5, %6 : vector<16x128xf32>
    %c0_6 = arith.constant 0 : index
    %c0_7 = arith.constant 0 : index
    %8 = vector.load %arg4[%c0_6, %c0_7] : memref<128x128xf32, #tpu.memory_space<vmem>>, vector<128x128xf32>
    %cst_8 = arith.constant dense<0.000000e+00> : vector<16x128xf32>
    %9 = tpu.matmul %7, %8, %cst_8 {dimension_numbers = #tpu.dot_dimension_numbers<[1], [0], [0], [1], [0, 0, 1, 1], [], []>} : vector<16x128xf32>, vector<128x128xf32>, vector<16x128xf32> -> vector<16x128xf32>
    %c0_9 = arith.constant 0 : index
    %c0_10 = arith.constant 0 : index
    %10 = vector.load %arg5[%c0_9, %c0_10] : memref<1x128xf32, #tpu.memory_space<vmem>>, vector<1x128xf32>
    %11 = vector.broadcast %10 : vector<1x128xf32> to vector<16x128xf32>
    %12 = arith.addf %9, %11 : vector<16x128xf32>
    %c0_11 = arith.constant 0 : index
    %c0_12 = arith.constant 0 : index
    %13 = vector.load %arg6[%c0_11, %c0_12] : memref<16x128xf32, #tpu.memory_space<vmem>>, vector<16x128xf32>
    tpu.vector_store %arg6[%c0_11, %c0_12], %12 {strides = array<i32>} : memref<16x128xf32, #tpu.memory_space<vmem>>, vector<16x128xf32>,
    return
  }
  func.func @transform_0(%arg0: i32) -> (i32, i32) {
    %c0_i32 = arith.constant 0 : i32
    %c0_i32_0 = arith.constant 0 : i32
    return %arg0, %c0_i32 : i32, i32
  }
  func.func @transform_1(%arg0: i32) -> (i32, i32) {
    %c0_i32 = arith.constant 0 : i32
    %c0_i32_0 = arith.constant 0 : i32
    %c0_i32_1 = arith.constant 0 : i32
    return %c0_i32, %c0_i32_0 : i32, i32
  }
  func.func @transform_2(%arg0: i32) -> (i32, i32) {
    %c0_i32 = arith.constant 0 : i32
    %c0_i32_0 = arith.constant 0 : i32
    %c0_i32_1 = arith.constant 0 : i32
    return %c0_i32, %c0_i32_0 : i32, i32
  }
  func.func @transform_3(%arg0: i32) -> (i32, i32) {
    %c0_i32 = arith.constant 0 : i32
    %c0_i32_0 = arith.constant 0 : i32
    %c0_i32_1 = arith.constant 0 : i32
    return %c0_i32, %c0_i32_0 : i32, i32
  }
  func.func @transform_4(%arg0: i32) -> (i32, i32) {
    %c0_i32 = arith.constant 0 : i32
    %c0_i32_0 = arith.constant 0 : i32
    %c0_i32_1 = arith.constant 0 : i32
    return %c0_i32, %c0_i32_0 : i32, i32
  }
  func.func @transform_5(%arg0: i32) -> (i32, i32) {
    %c0_i32 = arith.constant 0 : i32
    %c0_i32_0 = arith.constant 0 : i32
    return %arg0, %c0_i32 : i32, i32
  }
}

</mosaic_0001>

<bundles_post_ra>
// kernel: tpu_custom_call.1
= control target key start
LH: loop header
LB: loop body
LE: loop exit
PB: predicated region body
PF: predicated region fallthrough
CT: control target
= control target key end

     0   :  { %10 = vsyncpa [#allocation3], 0  ;;  %s511_s0 = inlined_call_operand.hbm [shape: f32[16,32], index: 0, kind: input, shape index: {}]   ;;  %s512_s1 = inlined_call_operand.hbm [shape: f32[32,128], index: 1, kind: input, shape index: {}]   ;;  %s513_s2 = inlined_call_operand.vmem [shape: f32[1,128], index: 2, kind: input, shape index: {}]   ;;  %s514_s3 = inlined_call_operand.hbm [shape: f32[128,128], index: 3, kind: input, shape index: {}]   ;;  %s515_s4 = inlined_call_operand.vmem [shape: f32[1,128], index: 4, kind: input, shape index: {}]   ;;  %s516_s5 = inlined_call_operand.hbm [shape: f32[16,128], index: 5, kind: output, shape index: {}]  }
   0x1   :  { %11 = vsyncpa [#allocation6], 0 }
   0x2   :  { %12 = vsyncpa [#allocation4], 0  ;;  %s443_s18 = smov [#allocation5]   ;;  %s444_s20 = smov [#allocation2]  }
   0x3   :  { %s30_s19 = sshll.u32 %s443_s18, 4  ;;  %s18_s21 = sshll.u32 %s444_s20, 4  ;;  %s31_s19 = int_to_ptr.vmem [resolvable:$true] %s30_s19  ;;  %s19_s21 = int_to_ptr.vmem [resolvable:$true] %s18_s21 }
   0x4   :  { %s365_s22 = scalar_lea.vmem %s31_s19, 512  ;;  %p370_p1 = scmp.lt.s32.totalorder %s31_s19, %s31_s19 }
   0x5   :  { %p366_p0 = scmp.ne.s32.totalorder %s31_s19, %s365_s22  ;;  %p371_p2 = scmp.lt.s32.totalorder %s365_s22, %s365_s22 }
   0x7   :  { %p372_p3 = por %p371_p2, %p370_p1 }
   0x9   :  { %p373_p4 = pnand %p372_p3, %p366_p0 }
   0xb   :  { %376 = shalt.err (!%p373_p4)
}
   0xc   :  { %s445_s23 = smov 128   ;;  %s446_s24 = smov 8  }
   0xd   :  { %36 = dma.hbm_to_vmem [thread:$0]  %s512_s1, 512, %s31_s19, [#allocation6], %s445_s23, %s445_s23, %s446_s24  }
   0xe   :  { %s385_s27 = scalar_lea.vmem %s19_s21, 256  ;;  %p390_p6 = scmp.lt.s32.totalorder %s19_s21, %s19_s21 }
   0xf   :  { %p386_p5 = scmp.ne.s32.totalorder %s19_s21, %s385_s27  ;;  %p391_p7 = scmp.lt.s32.totalorder %s385_s27, %s385_s27 }
  0x11   :  { %p392_p8 = por %p391_p7, %p390_p6 }
  0x13   :  { %p393_p9 = pnand %p392_p8, %p386_p5 }
  0x15   :  { %396 = shalt.err (!%p393_p9)
}
  0x16   :  { %24 = dma.hbm_to_vmem [thread:$0]  %s511_s0, 256, %s19_s21, [#allocation3], %s445_s23, %s445_s23, %s446_s24  }
  0x17   :  { %s447_s30 = smov [#allocation7]  }
  0x18   :  { %s44_s6 = sshll.u32 %s447_s30, 4  ;;  %s45_s6 = int_to_ptr.vmem [resolvable:$true] %s44_s6 }
  0x19   :  { %s405_s7 = scalar_lea.vmem %s45_s6, 2048  ;;  %p410_p11 = scmp.lt.s32.totalorder %s45_s6, %s45_s6 }
  0x1a   :  { %p406_p10 = scmp.ne.s32.totalorder %s45_s6, %s405_s7  ;;  %p411_p12 = scmp.lt.s32.totalorder %s405_s7, %s405_s7 }
  0x1c   :  { %p412_p13 = por %p411_p12, %p410_p11 }
  0x1e   :  { %p413_p0 = pnand %p412_p13, %p406_p10 }
  0x20   :  { %416 = shalt.err (!%p413_p0)
}
  0x21   :  { %50 = dma.hbm_to_vmem [thread:$0]  %s514_s3, 2048, %s45_s6, [#allocation6], %s445_s23, %s445_s23, %s446_s24  }
  0x22   :  { %437 = dma.done.wait [#allocation3], 256  }
  0x23   :  { %438 = vsyncadd [#allocation3], 4294967040 }
  0x24   :  { %439 = dma.done.wait [#allocation6], 2560  }
  0x25   :  { %440 = vsyncadd [#allocation6], 4294964736  ;;  %vm75_vm0 = vcmask 261120   ;;  %v67_v0 = vld [vmem:[#allocation5 + $0x18] sm:$0xff]  ;;  %v66_v1 = vld [vmem:[#allocation5 + $0x10] sm:$0xff]  ;;  %s448_s11 = smov [#allocation8]  }
  0x26   :  { %305 = vmatprep.subr.mxu0 %v67_v0  ;;  %v62_v2 = vld [vmem:[#allocation2] sm:$0xff]  ;;  %v65_v3 = vld [vmem:[#allocation5 + $0x8] sm:$0xff]  ;;  %v174_v4 = vld [vmem:[#allocation7 + $0x78] sm:$0xff]  ;;  %s264_s12 = sshll.u32 %s448_s11, 4  ;;  %s265_s12 = int_to_ptr.vmem [resolvable:$true] %s264_s12 }
  0x27   :  { %306 = vmatpush3.msra.mxu0 %v67_v0  ;;  %313 = vmatprep.mubr.msk.f32.mxu0 %vm75_vm0, %v62_v2  ;;  %v173_v5 = vld [vmem:[#allocation7 + $0x70] sm:$0xff]  ;;  %v64_v6 = vld [vmem:[#allocation5] sm:$0xff]  ;;  %v172_v7 = vld [vmem:[#allocation7 + $0x68] sm:$0xff]  ;;  %p422_p2 = scmp.lt.s32.totalorder %s265_s12, %s265_s12 }
  0x28   :  { %307 = vmatprep.subr.mxu0 %v66_v1  ;;  %316 = vmatprep.subr.mxu1 %v174_v4  ;;  %v63_v8 = vld [vmem:[#allocation2 + $0x8] sm:$0xff]  ;;  %v171_v9 = vld [vmem:[#allocation7 + $0x60] sm:$0xff]  ;;  %v169_v11 = vld [vmem:[#allocation7 + $0x50] sm:$0xff] }
  0x29   :  { %308 = vmatpush3.msra.mxu0 %v66_v1  ;;  %317 = vmatpush3.msra.mxu1 %v174_v4  ;;  %v170_v10 = vld [vmem:[#allocation7 + $0x58] sm:$0xff]  ;;  %v168_v12 = vld [vmem:[#allocation7 + $0x48] sm:$0xff]  ;;  %v167_v13 = vld [vmem:[#allocation7 + $0x40] sm:$0xff] }
  0x2a   :  { %309 = vmatprep.subr.mxu0 %v65_v3  ;;  %318 = vmatprep.subr.mxu1 %v173_v5  ;;  %v166_v14 = vld [vmem:[#allocation7 + $0x38] sm:$0xff]  ;;  %v165_v15 = vld [vmem:[#allocation7 + $0x30] sm:$0xff]  ;;  %v164_v16 = vld [vmem:[#allocation7 + $0x28] sm:$0xff] }
  0x2b   :  { %310 = vmatpush3.msra.mxu0 %v65_v3  ;;  %319 = vmatpush3.msra.mxu1 %v173_v5  ;;  %v163_v17 = vld [vmem:[#allocation7 + $0x20] sm:$0xff]  ;;  %v162_v18 = vld [vmem:[#allocation7 + $0x18] sm:$0xff]  ;;  %v161_v19 = vld [vmem:[#allocation7 + $0x10] sm:$0xff] }
  0x2c   :  { %311 = vmatprep.subr.mxu0 %v64_v6  ;;  %320 = vmatprep.subr.mxu1 %v172_v7  ;;  %v160_v20 = vld [vmem:[#allocation7 + $0x8] sm:$0xff]  ;;  %v159_v21 = vld [vmem:[#allocation7] sm:$0xff]  ;;  %v277_v22 = vld [vmem:[%s513_s2] ss:$0 sm:$0xff]  ;;  %s417_s2 = scalar_lea.vmem %s265_s12, 256 }
  0x2d   :  { %312 = vmatpush3.msra.mxu0 %v64_v6  ;;  %321 = vmatpush3.msra.mxu1 %v172_v7  ;;  %v280_v29 = vld [vmem:[%s515_s4] ss:$0 sm:$0xff]  ;;  %p418_p1 = scmp.ne.s32.totalorder %s265_s12, %s417_s2  ;;  %p423_p3 = scmp.lt.s32.totalorder %s417_s2, %s417_s2 }
  0x2e   :  { %314 = vmatmul.mubr.msk.f32.vlgmr.msra.gmra.mxu0 %vm75_vm0, %v63_v8  ;;  %322 = vmatprep.subr.mxu1 %v171_v9 }
  0x2f   :  { %323 = vmatpush3.msra.mxu1 %v171_v9  ;;  %p424_p4 = por %p423_p3, %p422_p2 }
  0x30   :  { %324 = vmatprep.subr.mxu1 %v170_v10 }
  0x31   :  { %325 = vmatpush3.msra.mxu1 %v170_v10  ;;  %p425_p5 = pnand %p424_p4, %p418_p1 }
  0x32   :  { %326 = vmatprep.subr.mxu1 %v169_v11 }
  0x33   :  { %327 = vmatpush3.msra.mxu1 %v169_v11 }
  0x34   :  { %328 = vmatprep.subr.mxu1 %v168_v12 }
  0x35   :  { %329 = vmatpush3.msra.mxu1 %v168_v12 }
  0x36   :  { %330 = vmatprep.subr.mxu1 %v167_v13 }
  0x37   :  { %331 = vmatpush3.msra.mxu1 %v167_v13 }
  0x38   :  { %332 = vmatprep.subr.mxu1 %v166_v14 }
  0x39   :  { %333 = vmatpush3.msra.mxu1 %v166_v14 }
  0x3a   :  { %334 = vmatprep.subr.mxu1 %v165_v15 }
  0x3b   :  { %335 = vmatpush3.msra.mxu1 %v165_v15 }
  0x3c   :  { %336 = vmatprep.subr.mxu1 %v164_v16 }
  0x3d   :  { %337 = vmatpush3.msra.mxu1 %v164_v16 }
  0x3e   :  { %338 = vmatprep.subr.mxu1 %v163_v17 }
  0x3f   :  { %339 = vmatpush3.msra.mxu1 %v163_v17 }
  0x40   :  { %340 = vmatprep.subr.mxu1 %v162_v18 }
  0x41   :  { %341 = vmatpush3.msra.mxu1 %v162_v18 }
  0x42   :  { %342 = vmatprep.subr.mxu1 %v161_v19 }
  0x43   :  { %343 = vmatpush3.msra.mxu1 %v161_v19 }
  0x44   :  { %344 = vmatprep.subr.mxu1 %v160_v20 }
  0x45   :  { %345 = vmatpush3.msra.mxu1 %v160_v20 }
  0x46   :  { %346 = vmatprep.subr.mxu1 %v159_v21 }
  0x47   :  { %347 = vmatpush3.msra.mxu1 %v159_v21 }
  0xee   :  { %v315_v23 = vpop.f32.mrf.mxu0 }
  0xef   :  { %v154_v24 = vadd.f32 %v315_v23, %v277_v22 }
  0xf0   :  { %v148_v25 = vpop.f32.mrf.mxu0 }
  0xf1   :  { %v149_v26 = vadd.f32 %v277_v22, %v148_v25  ;;  %v158_v28 = vmax.f32 %v154_v24, 0.0 }
  0xf3   :  { %v157_v27 = vmax.f32 %v149_v26, 0.0 }
  0xf5   :  { %348 = vmatprep.mubr.f32.mxu1 %v157_v27 }
  0xf6   :  { %349 = vmatmul.mubr.f32.vlgmr.msra.gmra.mxu1 %v158_v28 }
 0x1b6   :  { %v350_v30 = vpop.f32.mrf.mxu1 }
 0x1b7   :  { %v254_v31 = vadd.f32 %v350_v30, %v280_v29 }
 0x1b8   :  { %v248_v32 = vpop.f32.mrf.mxu1 }
 0x1b9   :  { %258 = vst [vmem:[#allocation8 + $0x8] sm:$0xff] %v254_v31  ;;  %v249_v33 = vadd.f32 %v280_v29, %v248_v32 }
 0x1bb   :  { %257 = vst [vmem:[#allocation8] sm:$0xff] %v249_v33 }
 0x1bc   :  { %428 = shalt.err (!%p425_p5)
}
 0x1bd   :  { %270 = dma.vmem_to_hbm [thread:$0]  %s265_s12, 256, %s516_s5, [#allocation4], %s445_s23, %s445_s23, %s446_s24  }
 0x1be   :  { %441 = dma.done.wait [#allocation4], 256  }
 0x1bf   :  { %442 = vsyncadd [#allocation4], 4294967040 }
 0x1c0   :  { %274 = vsyncpa [#allocation3], 1 }
 0x1c1   :  { %275 = vsyncpa [#allocation6], 1 }
 0x1c2   :  { %276 = vsyncpa [#allocation4], 1 }

// kernel: tpu_custom_call.1
= control target key start
LH: loop header
LB: loop body
LE: loop exit
PB: predicated region body
PF: predicated region fallthrough
CT: control target
= control target key end

     0   :  { %10 = vsyncpa [#allocation3], 0  ;;  %s511_s0 = inlined_call_operand.hbm [shape: f32[16,32], index: 0, kind: input, shape index: {}]   ;;  %s512_s1 = inlined_call_operand.hbm [shape: f32[32,128], index: 1, kind: input, shape index: {}]   ;;  %s513_s2 = inlined_call_operand.vmem [shape: f32[1,128], index: 2, kind: input, shape index: {}]   ;;  %s514_s3 = inlined_call_operand.hbm [shape: f32[128,128], index: 3, kind: input, shape index: {}]   ;;  %s515_s4 = inlined_call_operand.vmem [shape: f32[1,128], index: 4, kind: input, shape index: {}]   ;;  %s516_s5 = inlined_call_operand.hbm [shape: f32[16,128], index: 5, kind: output, shape index: {}]  }
   0x1   :  { %11 = vsyncpa [#allocation6], 0 }
   0x2   :  { %12 = vsyncpa [#allocation4], 0  ;;  %s443_s18 = smov [#allocation5]   ;;  %s444_s20 = smov [#allocation2]  }
   0x3   :  { %s30_s19 = sshll.u32 %s443_s18, 4  ;;  %s18_s21 = sshll.u32 %s444_s20, 4  ;;  %s31_s19 = int_to_ptr.vmem [resolvable:$true] %s30_s19  ;;  %s19_s21 = int_to_ptr.vmem [resolvable:$true] %s18_s21 }
   0x4   :  { %s365_s22 = scalar_lea.vmem %s31_s19, 512  ;;  %p370_p1 = scmp.lt.s32.totalorder %s31_s19, %s31_s19 }
   0x5   :  { %p366_p0 = scmp.ne.s32.totalorder %s31_s19, %s365_s22  ;;  %p371_p2 = scmp.lt.s32.totalorder %s365_s22, %s365_s22 }
   0x7   :  { %p372_p3 = por %p371_p2, %p370_p1 }
   0x9   :  { %p373_p4 = pnand %p372_p3, %p366_p0 }
   0xb   :  { %376 = shalt.err (!%p373_p4)
}
   0xc   :  { %s445_s23 = smov 128   ;;  %s446_s24 = smov 8  }
   0xd   :  { %36 = dma.hbm_to_vmem [thread:$0]  %s512_s1, 512, %s31_s19, [#allocation6], %s445_s23, %s445_s23, %s446_s24  }
   0xe   :  { %s385_s27 = scalar_lea.vmem %s19_s21, 256  ;;  %p390_p6 = scmp.lt.s32.totalorder %s19_s21, %s19_s21 }
   0xf   :  { %p386_p5 = scmp.ne.s32.totalorder %s19_s21, %s385_s27  ;;  %p391_p7 = scmp.lt.s32.totalorder %s385_s27, %s385_s27 }
  0x11   :  { %p392_p8 = por %p391_p7, %p390_p6 }
  0x13   :  { %p393_p9 = pnand %p392_p8, %p386_p5 }
  0x15   :  { %396 = shalt.err (!%p393_p9)
}
  0x16   :  { %24 = dma.hbm_to_vmem [thread:$0]  %s511_s0, 256, %s19_s21, [#allocation3], %s445_s23, %s445_s23, %s446_s24  }
  0x17   :  { %s447_s30 = smov [#allocation7]  }
  0x18   :  { %s44_s6 = sshll.u32 %s447_s30, 4  ;;  %s45_s6 = int_to_ptr.vmem [resolvable:$true] %s44_s6 }
  0x19   :  { %s405_s7 = scalar_lea.vmem %s45_s6, 2048  ;;  %p410_p11 = scmp.lt.s32.totalorder %s45_s6, %s45_s6 }
  0x1a   :  { %p406_p10 = scmp.ne.s32.totalorder %s45_s6, %s405_s7  ;;  %p411_p12 = scmp.lt.s32.totalorder %s405_s7, %s405_s7 }
  0x1c   :  { %p412_p13 = por %p411_p12, %p410_p11 }
  0x1e   :  { %p413_p0 = pnand %p412_p13, %p406_p10 }
  0x20   :  { %416 = shalt.err (!%p413_p0)
}
  0x21   :  { %50 = dma.hbm_to_vmem [thread:$0]  %s514_s3, 2048, %s45_s6, [#allocation6], %s445_s23, %s445_s23, %s446_s24  }
  0x22   :  { %437 = dma.done.wait [#allocation3], 256  }
  0x23   :  { %438 = vsyncadd [#allocation3], 4294967040 }
  0x24   :  { %439 = dma.done.wait [#allocation6], 2560  }
  0x25   :  { %440 = vsyncadd [#allocation6], 4294964736  ;;  %vm75_vm0 = vcmask 261120   ;;  %v67_v0 = vld [vmem:[#allocation5 + $0x18] sm:$0xff]  ;;  %v66_v1 = vld [vmem:[#allocation5 + $0x10] sm:$0xff]  ;;  %s448_s11 = smov [#allocation8]  }
  0x26   :  { %305 = vmatprep.subr.mxu0 %v67_v0  ;;  %v62_v2 = vld [vmem:[#allocation2] sm:$0xff]  ;;  %v65_v3 = vld [vmem:[#allocation5 + $0x8] sm:$0xff]  ;;  %v174_v4 = vld [vmem:[#allocation7 + $0x78] sm:$0xff]  ;;  %s264_s12 = sshll.u32 %s448_s11, 4  ;;  %s265_s12 = int_to_ptr.vmem [resolvable:$true] %s264_s12 }
  0x27   :  { %306 = vmatpush3.msra.mxu0 %v67_v0  ;;  %313 = vmatprep.mubr.msk.f32.mxu0 %vm75_vm0, %v62_v2  ;;  %v173_v5 = vld [vmem:[#allocation7 + $0x70] sm:$0xff]  ;;  %v64_v6 = vld [vmem:[#allocation5] sm:$0xff]  ;;  %v172_v7 = vld [vmem:[#allocation7 + $0x68] sm:$0xff]  ;;  %p422_p2 = scmp.lt.s32.totalorder %s265_s12, %s265_s12 }
  0x28   :  { %307 = vmatprep.subr.mxu0 %v66_v1  ;;  %316 = vmatprep.subr.mxu1 %v174_v4  ;;  %v63_v8 = vld [vmem:[#allocation2 + $0x8] sm:$0xff]  ;;  %v171_v9 = vld [vmem:[#allocation7 + $0x60] sm:$0xff]  ;;  %v169_v11 = vld [vmem:[#allocation7 + $0x50] sm:$0xff] }
  0x29   :  { %308 = vmatpush3.msra.mxu0 %v66_v1  ;;  %317 = vmatpush3.msra.mxu1 %v174_v4  ;;  %v170_v10 = vld [vmem:[#allocation7 + $0x58] sm:$0xff]  ;;  %v168_v12 = vld [vmem:[#allocation7 + $0x48] sm:$0xff]  ;;  %v167_v13 = vld [vmem:[#allocation7 + $0x40] sm:$0xff] }
  0x2a   :  { %309 = vmatprep.subr.mxu0 %v65_v3  ;;  %318 = vmatprep.subr.mxu1 %v173_v5  ;;  %v166_v14 = vld [vmem:[#allocation7 + $0x38] sm:$0xff]  ;;  %v165_v15 = vld [vmem:[#allocation7 + $0x30] sm:$0xff]  ;;  %v164_v16 = vld [vmem:[#allocation7 + $0x28] sm:$0xff] }
  0x2b   :  { %310 = vmatpush3.msra.mxu0 %v65_v3  ;;  %319 = vmatpush3.msra.mxu1 %v173_v5  ;;  %v163_v17 = vld [vmem:[#allocation7 + $0x20] sm:$0xff]  ;;  %v162_v18 = vld [vmem:[#allocation7 + $0x18] sm:$0xff]  ;;  %v161_v19 = vld [vmem:[#allocation7 + $0x10] sm:$0xff] }
  0x2c   :  { %311 = vmatprep.subr.mxu0 %v64_v6  ;;  %320 = vmatprep.subr.mxu1 %v172_v7  ;;  %v160_v20 = vld [vmem:[#allocation7 + $0x8] sm:$0xff]  ;;  %v159_v21 = vld [vmem:[#allocation7] sm:$0xff]  ;;  %v277_v22 = vld [vmem:[%s513_s2] ss:$0 sm:$0xff]  ;;  %s417_s2 = scalar_lea.vmem %s265_s12, 256 }
  0x2d   :  { %312 = vmatpush3.msra.mxu0 %v64_v6  ;;  %321 = vmatpush3.msra.mxu1 %v172_v7  ;;  %v280_v29 = vld [vmem:[%s515_s4] ss:$0 sm:$0xff]  ;;  %p418_p1 = scmp.ne.s32.totalorder %s265_s12, %s417_s2  ;;  %p423_p3 = scmp.lt.s32.totalorder %s417_s2, %s417_s2 }
  0x2e   :  { %314 = vmatmul.mubr.msk.f32.vlgmr.msra.gmra.mxu0 %vm75_vm0, %v63_v8  ;;  %322 = vmatprep.subr.mxu1 %v171_v9 }
  0x2f   :  { %323 = vmatpush3.msra.mxu1 %v171_v9  ;;  %p424_p4 = por %p423_p3, %p422_p2 }
  0x30   :  { %324 = vmatprep.subr.mxu1 %v170_v10 }
  0x31   :  { %325 = vmatpush3.msra.mxu1 %v170_v10  ;;  %p425_p5 = pnand %p424_p4, %p418_p1 }
  0x32   :  { %326 = vmatprep.subr.mxu1 %v169_v11 }
  0x33   :  { %327 = vmatpush3.msra.mxu1 %v169_v11 }
  0x34   :  { %328 = vmatprep.subr.mxu1 %v168_v12 }
  0x35   :  { %329 = vmatpush3.msra.mxu1 %v168_v12 }
  0x36   :  { %330 = vmatprep.subr.mxu1 %v167_v13 }
  0x37   :  { %331 = vmatpush3.msra.mxu1 %v167_v13 }
  0x38   :  { %332 = vmatprep.subr.mxu1 %v166_v14 }
  0x39   :  { %333 = vmatpush3.msra.mxu1 %v166_v14 }
  0x3a   :  { %334 = vmatprep.subr.mxu1 %v165_v15 }
  0x3b   :  { %335 = vmatpush3.msra.mxu1 %v165_v15 }
  0x3c   :  { %336 = vmatprep.subr.mxu1 %v164_v16 }
  0x3d   :  { %337 = vmatpush3.msra.mxu1 %v164_v16 }
  0x3e   :  { %338 = vmatprep.subr.mxu1 %v163_v17 }
  0x3f   :  { %339 = vmatpush3.msra.mxu1 %v163_v17 }
  0x40   :  { %340 = vmatprep.subr.mxu1 %v162_v18 }
  0x41   :  { %341 = vmatpush3.msra.mxu1 %v162_v18 }
  0x42   :  { %342 = vmatprep.subr.mxu1 %v161_v19 }
  0x43   :  { %343 = vmatpush3.msra.mxu1 %v161_v19 }
  0x44   :  { %344 = vmatprep.subr.mxu1 %v160_v20 }
  0x45   :  { %345 = vmatpush3.msra.mxu1 %v160_v20 }
  0x46   :  { %346 = vmatprep.subr.mxu1 %v159_v21 }
  0x47   :  { %347 = vmatpush3.msra.mxu1 %v159_v21 }
  0xee   :  { %v315_v23 = vpop.f32.mrf.mxu0 }
  0xef   :  { %v154_v24 = vadd.f32 %v315_v23, %v277_v22 }
  0xf0   :  { %v148_v25 = vpop.f32.mrf.mxu0 }
  0xf1   :  { %v149_v26 = vadd.f32 %v277_v22, %v148_v25  ;;  %v158_v28 = vmax.f32 %v154_v24, 0.0 }
  0xf3   :  { %v157_v27 = vmax.f32 %v149_v26, 0.0 }
  0xf5   :  { %348 = vmatprep.mubr.f32.mxu1 %v157_v27 }
  0xf6   :  { %349 = vmatmul.mubr.f32.vlgmr.msra.gmra.mxu1 %v158_v28 }
 0x1b6   :  { %v350_v30 = vpop.f32.mrf.mxu1 }
 0x1b7   :  { %v254_v31 = vadd.f32 %v350_v30, %v280_v29 }
 0x1b8   :  { %v248_v32 = vpop.f32.mrf.mxu1 }
 0x1b9   :  { %258 = vst [vmem:[#allocation8 + $0x8] sm:$0xff] %v254_v31  ;;  %v249_v33 = vadd.f32 %v280_v29, %v248_v32 }
 0x1bb   :  { %257 = vst [vmem:[#allocation8] sm:$0xff] %v249_v33 }
 0x1bc   :  { %428 = shalt.err (!%p425_p5)
}
 0x1bd   :  { %270 = dma.vmem_to_hbm [thread:$0]  %s265_s12, 256, %s516_s5, [#allocation4], %s445_s23, %s445_s23, %s446_s24  }
 0x1be   :  { %441 = dma.done.wait [#allocation4], 256  }
 0x1bf   :  { %442 = vsyncadd [#allocation4], 4294967040 }
 0x1c0   :  { %274 = vsyncpa [#allocation3], 1 }
 0x1c1   :  { %275 = vsyncpa [#allocation6], 1 }
 0x1c2   :  { %276 = vsyncpa [#allocation4], 1 }

</bundles_post_ra>
